<compile_context>
chip_gen: v5e
topology: v5e:2x2
jax: 0.10.0
libtpu: 0.0.40
codegen_flags: <defaults>
</compile_context>

<pallas_src>
import jax
import jax.numpy as jnp
from jax import lax
from jax.experimental import pallas as pl
from jax.experimental.pallas import tpu as pltpu

GAMMA = 1.5          # pow implemented as t*sqrt(t)  (valid for gamma == 1.5)
ALPHA = 0.25         # alpha > 0 -> alpha branch is always taken (static)
_A0 = 1.0 - ALPHA    # alpha_factor = _A0 + z * _A1
_A1 = 2.0 * ALPHA - 1.0


def _pick_tb(N: int, C: int, bytes_per_elem: int, *,
             budget_bytes: int = 16 << 20, cap: int = 4096,
             min_blocks: int = 8) -> int:
    """Largest row tile under the double-buffered VMEM budget, while keeping
    enough grid steps for DMA/compute overlap. N need NOT be divisible by it."""
    if N <= 8:
        return N
    per_row = 2 * C * bytes_per_elem                       # 2 pipeline buffers
    max_rows = max(8, min((budget_bytes // per_row) // 8 * 8, cap))
    want = max(8, ((-(-N // min_blocks)) + 7) // 8 * 8)    # ~min_blocks steps
    return min(max_rows, want, (N + 7) // 8 * 8)


def focal_loss(pred: jax.Array, label: jax.Array, *,
               tb: int | None = None, input_buffers: int = 2) -> jax.Array:
    """pred, label: (N, C). Any float/int dtype; upcast to f32 in-kernel.
    Returns scalar focal loss == loss.mean(1).sum()."""
    N, C = pred.shape
    assert label.shape == (N, C), "pred/label must share shape (N, C)"

    in_bytes = pred.dtype.itemsize + label.dtype.itemsize
    if tb is None:
        tb = _pick_tb(N, C, in_bytes)
    tb = int(tb)
    if N <= 8:
        tb = N                                   # single block == full dim (legal)
    else:
        tb = min(max(tb, 8), (N + 7) // 8 * 8)
        if tb % 8:
            tb = (tb + 7) // 8 * 8               # keep the (8,128) sublane rule

    nblocks = -(-N // tb)
    P = 2 if nblocks >= 2 else 1                 # always engage both v7x TCs
    S = -(-nblocks // P)
    need_mask = (P * S * tb != N)                # partial tail and/or ghost steps
    acc_rows = 8 if tb % 8 == 0 else 1
    inv_C = 1.0 / float(C)

    def kernel(pred_ref, label_ref, out_ref, acc_ref):
        s = pl.program_id(1)

        @pl.when(s == 0)
        def _init():
            acc_ref[...] = jnp.zeros_like(acc_ref)

        x = pred_ref[...].astype(jnp.float32)    # logits  (tb, C)
        z = label_ref[...].astype(jnp.float32)   # targets (tb, C)

        # Shared transcendental: e = exp(-|x|) serves both BCE and sigmoid.
        e = jnp.exp(-jnp.abs(x))
        # Numerically stable BCE-with-logits: max(x,0) - x*z + log(1+exp(-|x|))
        bce = jnp.maximum(x, 0.0) - x * z + jnp.log1p(e)
        # sigmoid(x) from shared e:  x>=0 -> 1/(1+e),  x<0 -> e/(1+e)
        inv = pl.reciprocal(1.0 + e, approx=True)        # EUP vrcp, nearly free
        p = jnp.where(x >= 0.0, inv, e * inv)
        # t = 1 - p_t = p + z - 2*p*z  (clamp: approx recip may push p past 1)
        t = jnp.maximum(p + z - 2.0 * p * z, 0.0)
        loss = bce * (t * jnp.sqrt(t)) * (_A0 + z * _A1)

        if need_mask:
            # Zero rows past N (partial tail block and/or ghost step).  A plain
            # select is enough: NaNs in unselected lanes never propagate.
            blk = pl.program_id(0) * S + s                 # unclamped block id
            row = lax.broadcasted_iota(jnp.int32, (tb, C), 0)
            loss = jnp.where(blk * tb + row < N, loss, 0.0)

        # Fold (tb, C) -> (acc_rows, C) with pure vreg-wise VPU adds.
        if acc_rows == 8:
            partial = loss.reshape(tb // 8, 8, C).sum(axis=0)
        else:
            partial = loss.sum(axis=0, keepdims=True)
        acc_ref[...] += partial

        # Epilogue: finish the reduction in-kernel (one XLU reduce per core).
        @pl.when(s == pl.num_programs(1) - 1)
        def _fin():
            col = jnp.sum(acc_ref[...], axis=0, keepdims=True)     # (1, C)
            tot = jnp.sum(col, axis=1, keepdims=True) * inv_C      # (1, 1)
            out_ref[...] = tot.reshape(1, 1, 1)

    def in_map(pi, si):
        # Clamp ghost steps to the last real block (their contribution is masked).
        return (jnp.minimum(pi * S + si, nblocks - 1), 0)

    if input_buffers > 2:
        in_spec = pl.BlockSpec((tb, C), in_map,
                               pipeline_mode=pl.Buffered(input_buffers))
    else:
        in_spec = pl.BlockSpec((tb, C), in_map)

    per_core = pl.pallas_call(
        kernel,
        out_shape=jax.ShapeDtypeStruct((P, 1, 1), jnp.float32),
        grid_spec=pltpu.PrefetchScalarGridSpec(
            num_scalar_prefetch=0,
            grid=(P, S),
            in_specs=[in_spec, in_spec],
            out_specs=pl.BlockSpec((1, 1, 1), lambda pi, si: (pi, 0, 0)),
            scratch_shapes=[pltpu.VMEM((acc_rows, C), jnp.float32)],
        ),
        compiler_params=pltpu.CompilerParams(
            dimension_semantics=("parallel", "arbitrary"),
            vmem_limit_bytes=32 << 20,   # fits v7x's 64 MiB and v5e/v6e 128 MiB
        ),
    )(pred, label)

    # Only a sum over <= 2 per-TensorCore scalars remains outside the kernel.
    return jnp.sum(per_core)


def focal_loss_ref(pred, label, gamma=GAMMA, alpha=ALPHA):
    """Pure-JAX reference mirroring the PyTorch module."""
    pred = pred.astype(jnp.float32)
    label = label.astype(jnp.float32)
    bce = (jnp.maximum(pred, 0.0) - pred * label
           + jnp.log1p(jnp.exp(-jnp.abs(pred))))
    p = jax.nn.sigmoid(pred)
    p_t = label * p + (1 - label) * (1 - p)
    loss = bce * (1.0 - p_t) ** gamma
    loss = loss * (label * alpha + (1 - label) * (1 - alpha))
    return loss.mean(1).sum()


if __name__ == "__main__":
    key = jax.random.PRNGKey(0)
    k1, k2, k3, k4, k5, k6 = jax.random.split(key, 6)
    C = 128

    # 1) f32 inputs, auto tile; even block count -> grid (2, 1), no masking.
    N = 16
    pred = jax.random.normal(k1, (N, C), dtype=jnp.float32) * 2.0
    label = (jax.random.uniform(k2, (N, C)) > 0.7).astype(jnp.float32)
    out = jax.block_until_ready(focal_loss(pred, label))
    ref = focal_loss_ref(pred, label)
    # approx reciprocal (EUP vrcp) costs a few 1e-4 of relative accuracy.
    assert jnp.allclose(out, ref, rtol=5e-3, atol=1e-3), (out, ref)

    # 2) Narrowed inputs (bf16 logits + int8 labels) and ragged N
    #    (partial tail block -> row mask). tb=32 keeps int8 sublane packing aligned.
    N2 = 40
    pred2 = (jax.random.normal(k3, (N2, C), dtype=jnp.float32) * 2.0).astype(jnp.bfloat16)
    label2 = (jax.random.uniform(k4, (N2, C)) > 0.7).astype(jnp.int8)
    out2 = jax.block_until_ready(focal_loss(pred2, label2, tb=32))
    ref2 = focal_loss_ref(pred2, label2)
    assert jnp.allclose(out2, ref2, rtol=5e-3, atol=1e-3), (out2, ref2)

    # 3) Odd block count -> ghost step on the second core half (clamp + mask).
    N3 = 40
    pred3 = jax.random.normal(k5, (N3, C), dtype=jnp.float32) * 2.0
    label3 = (jax.random.uniform(k6, (N3, C)) > 0.7).astype(jnp.float32)
    out3 = jax.block_until_ready(focal_loss(pred3, label3, tb=16))
    ref3 = focal_loss_ref(pred3, label3)
    assert jnp.allclose(out3, ref3, rtol=5e-3, atol=1e-3), (out3, ref3)

    print("KERNEL_OK")
</pallas_src>

<mosaic_0001>
module attributes {stable_mosaic.version = 11 : i64} {
  func.func @kernel(%arg0: i32, %arg1: i32, %arg2: memref<8x128xf32, #tpu.memory_space<vmem>>, %arg3: memref<8x128xf32, #tpu.memory_space<vmem>>, %arg4: memref<1x1x1xf32, #tpu.memory_space<vmem>>, %arg5: memref<8x128xf32, #tpu.memory_space<vmem>>) attributes {dimension_semantics = [#tpu.dimension_semantics<parallel>, #tpu.dimension_semantics<arbitrary>], iteration_bounds = array<i64: 2, 1>, scalar_prefetch = 0 : i64, scratch_operands = 1 : i64, tpu.core_type = #tpu.core_type<tc>, window_params = [{transform_indices = @transform_0, window_bounds = array<i64: 8, 128>}, {transform_indices = @transform_1, window_bounds = array<i64: 8, 128>}, {transform_indices = @transform_2, window_bounds = array<i64: 1, 1, 1>}]} {
    %c0_i32 = arith.constant 0 : i32
    %0 = arith.cmpi eq, %arg1, %c0_i32 : i32
    %1 = arith.extui %0 : i1 to i32
    %c0_i32_0 = arith.constant 0 : i32
    %2 = arith.cmpi ne, %1, %c0_i32_0 : i32
    scf.if %2 {
      %cst_18 = arith.constant 0.000000e+00 : f32
      %45 = vector.broadcast %cst_18 : f32 to vector<8x128xf32>
      %c0_19 = arith.constant 0 : index
      %c0_20 = arith.constant 0 : index
      %46 = vector.load %arg5[%c0_19, %c0_20] : memref<8x128xf32, #tpu.memory_space<vmem>>, vector<8x128xf32>
      tpu.vector_store %arg5[%c0_19, %c0_20], %45 {strides = array<i32>} : memref<8x128xf32, #tpu.memory_space<vmem>>, vector<8x128xf32>,
    } else {
    }
    %c0 = arith.constant 0 : index
    %c0_1 = arith.constant 0 : index
    %3 = vector.load %arg2[%c0, %c0_1] : memref<8x128xf32, #tpu.memory_space<vmem>>, vector<8x128xf32>
    %c0_2 = arith.constant 0 : index
    %c0_3 = arith.constant 0 : index
    %4 = vector.load %arg3[%c0_2, %c0_3] : memref<8x128xf32, #tpu.memory_space<vmem>>, vector<8x128xf32>
    %5 = math.absf %3 : vector<8x128xf32>
    %cst = arith.constant 0.000000e+00 : f32
    %6 = vector.broadcast %cst : f32 to vector<8x128xf32>
    %7 = arith.subf %6, %5 : vector<8x128xf32>
    %8 = math.exp %7 : vector<8x128xf32>
    %cst_4 = arith.constant 0.000000e+00 : f32
    %9 = vector.broadcast %cst_4 : f32 to vector<8x128xf32>
    %10 = arith.maximumf %3, %9 : vector<8x128xf32>
    %11 = arith.mulf %3, %4 : vector<8x128xf32>
    %12 = arith.subf %10, %11 : vector<8x128xf32>
    %13 = math.log1p %8 : vector<8x128xf32>
    %14 = arith.addf %12, %13 : vector<8x128xf32>
    %cst_5 = arith.constant 1.000000e+00 : f32
    %15 = vector.broadcast %cst_5 : f32 to vector<8x128xf32>
    %16 = arith.addf %15, %8 : vector<8x128xf32>
    %17 = tpu.reciprocal %16 {approx = true} : vector<8x128xf32> -> vector<8x128xf32>
    %cst_6 = arith.constant 0.000000e+00 : f32
    %18 = vector.broadcast %cst_6 : f32 to vector<8x128xf32>
    %19 = arith.cmpf oge, %3, %18 : vector<8x128xf32>
    %20 = arith.mulf %8, %17 : vector<8x128xf32>
    %21 = arith.select %19, %17, %20 : vector<8x128xi1>, vector<8x128xf32>
    %22 = arith.addf %21, %4 : vector<8x128xf32>
    %cst_7 = arith.constant 2.000000e+00 : f32
    %23 = vector.broadcast %cst_7 : f32 to vector<8x128xf32>
    %24 = arith.mulf %23, %21 : vector<8x128xf32>
    %25 = arith.mulf %24, %4 : vector<8x128xf32>
    %26 = arith.subf %22, %25 : vector<8x128xf32>
    %cst_8 = arith.constant 0.000000e+00 : f32
    %27 = vector.broadcast %cst_8 : f32 to vector<8x128xf32>
    %28 = arith.maximumf %26, %27 : vector<8x128xf32>
    %29 = math.sqrt %28 : vector<8x128xf32>
    %30 = arith.mulf %28, %29 : vector<8x128xf32>
    %31 = arith.mulf %14, %30 : vector<8x128xf32>
    %cst_9 = arith.constant -5.000000e-01 : f32
    %32 = vector.broadcast %cst_9 : f32 to vector<8x128xf32>
    %33 = arith.mulf %4, %32 : vector<8x128xf32>
    %cst_10 = arith.constant 7.500000e-01 : f32
    %34 = vector.broadcast %cst_10 : f32 to vector<8x128xf32>
    %35 = arith.addf %34, %33 : vector<8x128xf32>
    %36 = arith.mulf %31, %35 : vector<8x128xf32>
    %37 = vector.shape_cast %36 : vector<8x128xf32> to vector<1x8x128xf32>
    %cst_11 = arith.constant dense<0.000000e+00> : vector<8x128xf32>
    %38 = vector.multi_reduction <add>, %37, %cst_11 [0] : vector<1x8x128xf32> to vector<8x128xf32>
    %c0_12 = arith.constant 0 : index
    %c0_13 = arith.constant 0 : index
    %39 = vector.load %arg5[%c0_12, %c0_13] : memref<8x128xf32, #tpu.memory_space<vmem>>, vector<8x128xf32>
    %40 = arith.addf %39, %38 : vector<8x128xf32>
    %c0_14 = arith.constant 0 : index
    %c0_15 = arith.constant 0 : index
    %41 = vector.load %arg5[%c0_14, %c0_15] : memref<8x128xf32, #tpu.memory_space<vmem>>, vector<8x128xf32>
    tpu.vector_store %arg5[%c0_14, %c0_15], %40 {strides = array<i32>} : memref<8x128xf32, #tpu.memory_space<vmem>>, vector<8x128xf32>,
    %c0_i32_16 = arith.constant 0 : i32
    %42 = arith.cmpi eq, %arg1, %c0_i32_16 : i32
    %43 = arith.extui %42 : i1 to i32
    %c0_i32_17 = arith.constant 0 : i32
    %44 = arith.cmpi ne, %43, %c0_i32_17 : i32
    scf.if %44 {
      %c0_18 = arith.constant 0 : index
      %c0_19 = arith.constant 0 : index
      %45 = vector.load %arg5[%c0_18, %c0_19] : memref<8x128xf32, #tpu.memory_space<vmem>>, vector<8x128xf32>
      %cst_20 = arith.constant dense<0.000000e+00> : vector<128xf32>
      %46 = vector.multi_reduction <add>, %45, %cst_20 [0] : vector<8x128xf32> to vector<128xf32>
      %47 = vector.shape_cast %46 : vector<128xf32> to vector<1x128xf32>
      %cst_21 = arith.constant dense<0.000000e+00> : vector<1xf32>
      %48 = vector.multi_reduction <add>, %47, %cst_21 [1] : vector<1x128xf32> to vector<1xf32>
      %49 = vector.shape_cast %48 : vector<1xf32> to vector<1x1xf32>
      %cst_22 = arith.constant 7.812500e-03 : f32
      %50 = vector.broadcast %cst_22 : f32 to vector<1x1xf32>
      %51 = arith.mulf %49, %50 : vector<1x1xf32>
      %52 = vector.shape_cast %51 : vector<1x1xf32> to vector<1x1x1xf32>
      %c0_23 = arith.constant 0 : index
      %c0_24 = arith.constant 0 : index
      %c0_25 = arith.constant 0 : index
      %53 = vector.load %arg4[%c0_23, %c0_24, %c0_25] : memref<1x1x1xf32, #tpu.memory_space<vmem>>, vector<1x1x1xf32>
      tpu.vector_store %arg4[%c0_23, %c0_24, %c0_25], %52 {strides = array<i32>} : memref<1x1x1xf32, #tpu.memory_space<vmem>>, vector<1x1x1xf32>,
    } else {
    }
    return
  }
  func.func @transform_0(%arg0: i32, %arg1: i32) -> (i32, i32) {
    %c1_i32 = arith.constant 1 : i32
    %0 = arith.muli %arg0, %c1_i32 : i32
    %1 = arith.addi %0, %arg1 : i32
    %c1_i32_0 = arith.constant 1 : i32
    %2 = arith.minsi %1, %c1_i32_0 : i32
    %c0_i32 = arith.constant 0 : i32
    %c0_i32_1 = arith.constant 0 : i32
    return %2, %c0_i32 : i32, i32
  }
  func.func @transform_1(%arg0: i32, %arg1: i32) -> (i32, i32) {
    %c1_i32 = arith.constant 1 : i32
    %0 = arith.muli %arg0, %c1_i32 : i32
    %1 = arith.addi %0, %arg1 : i32
    %c1_i32_0 = arith.constant 1 : i32
    %2 = arith.minsi %1, %c1_i32_0 : i32
    %c0_i32 = arith.constant 0 : i32
    %c0_i32_1 = arith.constant 0 : i32
    return %2, %c0_i32 : i32, i32
  }
  func.func @transform_2(%arg0: i32, %arg1: i32) -> (i32, i32, i32) {
    %c0_i32 = arith.constant 0 : i32
    %c0_i32_0 = arith.constant 0 : i32
    %c0_i32_1 = arith.constant 0 : i32
    return %arg0, %c0_i32, %c0_i32_0 : i32, i32, i32
  }
}

</mosaic_0001>

<bundles_post_ra>
// kernel: tpu_custom_call.1
= control target key start
LH: loop header
LB: loop body
LE: loop exit
PB: predicated region body
PF: predicated region fallthrough
CT: control target
= control target key end

     0   :  { %7 = vsyncpa [#allocation4], 0  ;;  %s702_s0 = inlined_call_operand.hbm [shape: f32[16,128], index: 0, kind: input, shape index: {}]   ;;  %s703_s1 = inlined_call_operand.hbm [shape: f32[16,128], index: 1, kind: input, shape index: {}]   ;;  %s704_s2 = inlined_call_operand.vmem [shape: f32[2,1,1], index: 2, kind: output, shape index: {}]  }
   0x1   :  { %9 = vsyncpa [#allocation4 + $0x1], 0 }
   0x2   :  { %10 = vsyncpa [#allocation6], 0 }
   0x3   :  { %12 = vsyncpa [#allocation6 + $0x1], 0  ;;  %s606_s9 = smov 0   ;;  %s608_s10 = smov 0  }
   0x4   :  { %s610_s11 = smov 0   ;;  %s612_s12 = smov 0  }
   0x5   :  { %s614_s13 = smov 0   ;;  %s616_s14 = smov 0  }
   0x6 LB: > { %s394_s15 = sadd.s32 4294967295, %s589_s14   ;;  %s30_s16 = sadd.s32 1, %s585_s13  ;;  %s589_s14 = sphi %s616_s14, %s18_s14   ;;  %s585_s13 = sphi %s614_s13, %s711_s13   ;;  %s581_s12 = sphi %s612_s12, %s710_s12   ;;  %s577_s11 = sphi %s610_s11, %s709_s11   ;;  %s573_s10 = sphi %s608_s10, %s708_s10   ;;  %s569_s9 = sphi %s606_s9, %s707_s9  }
   0x7   : > { %p32_p0 = scmp.ge.s32.totalorder %s30_s16, 2  ;;  %p35_p1 = scmp.lt.s32.totalorder %s585_s13, 1 }
   0x8   : > { %s43_s17 = sadd.s32 1, %s577_s11  ;;  %p50_p2 = scmp.ne.s32.totalorder %s577_s11, %s573_s10 }
   0x9   : > { %s713_s16 = smov (%p32_p0, %s30_s16), 0  ;;  %p51_p4 = scmp.eq.s32.totalorder %s589_s14, 0 }
   0xa   : > { %s36_s18 = scalar_select %p35_p1, %s585_s13, 1 }
   0xb   : > { %p38_p3 = scmp.lt.s32.totalorder %s713_s16, 1  ;;  %p56_p5 = scmp.ne.s32.totalorder %s573_s10, %s569_s9 }
   0xc   : > { %p57_p6 = scmp.eq.s32.totalorder %s394_s15, 0  ;;  %p647_p7 = por %p51_p4, %p50_p2 }
   0xd   : > { %s39_s19 = scalar_select %p38_p3, %s713_s16, 1 }
   0xe   : > { %p651_p8 = por %p57_p6, %p56_p5  ;;  %p418_p10 = scmp.lt.s32.totalorder %s589_s14, 2 }
   0xf   : > { %s40_s22 = ssub.s32 %s36_s18, %s39_s19  ;;  %s138_s23 = sand.u32 1, %s577_s11  }
  0x10   : > { %p41_p9 = scmp.eq.s32.totalorder %s40_s22, 0  ;;  %s399_s24 = sshll.u32 %s36_s18, 3 }
  0x11   : > { %s398_s26 = sshll.u32 %s138_s23, 3  ;;  %s149_s29 = scalar_lea.hbm %s702_s0, %s399_s24 }
  0x12   : > { %s658_s25 = scalar_select %p41_p9, %s577_s11, %s43_s17  }
  0x13   : > { %s151_s30 = sshll.u32 %s149_s29, 4  ;;  %s142_s3 = scalar_lea.vmem [#allocation3], %s398_s26  ;;  %s152_s30 = int_to_ptr.hbm [resolvable:$true] %s151_s30 }
  0x14   : > { %s153_s4 = sshll.u32 %s142_s3, 4  ;;  %p412_p11 = pnand %p418_p10, %p647_p7  ;;  %s154_s4 = int_to_ptr.vmem [resolvable:$true] %s153_s4 }
  0x15   : > { %p402_p12 = scmp.ge.s32.totalorder %s589_s14, 1  ;;  %p180_p13 = scmp.lt.s32.totalorder %s589_s14, 3 }
  0x16   : > { %s139_s5 = scalar_lea.sflag [#allocation4], %s138_s23  ;;  %s171_s8 = scalar_lea.hbm %s703_s1, %s399_s24 }
  0x17   : > { %414 = dma.hbm_to_vmem [thread:$0]  (!%p412_p11), %s152_s30, 128, %s154_s4, %s139_s5  }
  0x18   : > { %p181_p0 = pnand %p402_p12, %p180_p13  ;;  %s173_s9 = sshll.u32 %s171_s8, 4  ;;  %s174_s9 = int_to_ptr.hbm [resolvable:$true] %s173_s9 }
  0x19   : > { %s164_s15 = scalar_lea.vmem [#allocation5], %s398_s26  ;;  %s161_s18 = scalar_lea.sflag [#allocation6], %s138_s23 }
  0x1a   : > { %s175_s17 = sshll.u32 %s164_s15, 4  ;;  %184 = sbr.rel (%p181_p0) target bundleno = 226 (0xe2), region = 28  ;;  %s176_s17 = int_to_ptr.vmem [resolvable:$true] %s175_s17 }
  0x1b   : > { %417 = dma.hbm_to_vmem [thread:$0]  (!%p412_p11), %s174_s9, 128, %s176_s17, %s161_s18  }
  0x1c   : > { %s186_s19 = sand.u32 (!%p181_p0), 1, %s573_s10  }
  0x1d   : > { %s403_s20 = sshll.u32 (!%p181_p0), %s186_s19, 3  ;;  %s187_s22 = scalar_lea.sflag (!%p181_p0), [#allocation4], %s186_s19 }
  0x1e   : > { %s190_s27 = scalar_lea.vmem (!%p181_p0), [#allocation3], %s403_s20 }
  0x1f   : > { %560 = dma.done.wait (%p651_p8), %s187_s22, 128  }
  0x20   : > { %562 = vsyncadd (%p651_p8), %s187_s22, 4294967168  ;;  %s197_s24 = scalar_lea.sflag [#allocation6], %s186_s19  ;;  %s200_s26 = scalar_lea.vmem [#allocation5], %s403_s20 }
  0x21   : > { %564 = dma.done.wait (%p651_p8), %s197_s24, 128  }
  0x22   : > { %566 = vsyncadd (%p651_p8), %s197_s24, 4294967168  ;;  %v239_v0 = vld [vmem:[%s190_s27] sm:$0xff]  ;;  %v240_v7 = vld [vmem:[%s200_s26] sm:$0xff]  ;;  %p231_p1 = scmp.lt.s32.totalorder %s581_s12, 1  ;;  %vm302_vm4 = vcmask 0  }
  0x23   : > { %v241_v1 = vand.u32 2147483647, %v239_v0  ;;  %vm260_vm0 = vcmp.ge.f32.partialorder %v239_v0, 0.0  ;;  %v245_v22 = vmax.f32 %v239_v0, 0.0  ;;  %v246_v23 = vmul.f32 %v240_v7, %v239_v0 }
  0x24   : > { %v282_v33 = vmul.f32 -0.5, %v240_v7  ;;  %s715_s12 = smov (!%p231_p1, %s581_s12), 1 }
  0x25   : > { %v242_v2 = vsub.f32 0.0, %v241_v1  ;;  %v247_v28 = vsub.f32 %v245_v22, %v246_v23  ;;  %s233_s28 = scalar_lea.vmem %s704_s2, %s715_s12 }
  0x26   : > { %v283_v38 = vadd.f32 0.75, %v282_v33 }
  0x27   : > { %v243_v3 = vmul.f32 1.442695, %v242_v2 }
  0x29   : > { %467 = vpow2.f32 %v243_v3 }
  0x2f   : > { %v468_v4 = vpop.eup %467 }
  0x30   : > { %v248_v5 = vadd.f32 1.0, %v468_v4  ;;  %v251_v15 = vmul.f32 -0.5, %v468_v4  ;;  %v254_v20 = vand.u32 2147483647, %v468_v4 }
  0x32   : > { %469 = vrcp.f32 %v248_v5  ;;  %v252_v18 = vadd.f32 1.0, %v251_v15  ;;  %vm255_vm1 = vcmp.lt.f32.partialorder %v254_v20, 0.0004427343 }
  0x34   : > { %v253_v26 = vmul.f32 %v468_v4, %v252_v18 }
  0x38   : > { %v470_v6 = vpop.eup %469 }
  0x39   : > { %v261_v8 = vmul.f32 %v470_v6, %v468_v4 }
  0x3b   : > { %v262_v9 = vsel %vm260_vm0, %v470_v6, %v261_v8 }
  0x3c   : > { %v263_v10 = vadd.f32 %v262_v9, %v240_v7  ;;  %v264_v11 = vmul.f32 2.0, %v262_v9 }
  0x3e   : > { %v265_v12 = vmul.f32 %v264_v11, %v240_v7 }
  0x40   : > { %v266_v13 = vsub.f32 %v263_v10, %v265_v12 }
  0x42   : > { %v267_v14 = vmax.f32 %v266_v13, 0.0 }
  0x44   : > { %471 = vrsqrt.f32 %v267_v14  ;;  %vm275_vm2 = vcmp.eq.f32.partialorder %v267_v14, inf  ;;  %v278_v31 = vand.u32 2147483648, %v267_v14  ;;  %vm277_vm3 = vcmp.eq.f32.partialorder %v267_v14, 0.0 }
  0x45   : > { %473 = vlog2.f32 %v248_v5 }
  0x4a   : > { %v472_v16 = vpop.eup %471 }
  0x4b   : > { %v269_v17 = vmul.f32 %v472_v16, %v267_v14  ;;  %v474_v19 = vpop.eup %473 }
  0x4c   : > { %v250_v25 = vmul.f32 0.6931472, %v474_v19 }
  0x4d   : > { %v270_v21 = vmul.f32 %v472_v16, %v269_v17 }
  0x4e   : > { %v256_v30 = vsel %vm255_vm1, %v253_v26, %v250_v25 }
  0x4f   : > { %v271_v24 = vmul.f32 0.5, %v270_v21  ;;  %v257_v34 = vadd.f32 %v256_v30, %v247_v28 }
  0x51   : > { %v272_v27 = vsub.f32 1.5, %v271_v24 }
  0x53   : > { %v273_v29 = vmul.f32 %v472_v16, %v272_v27 }
  0x55   : > { %v274_v32 = vmul.f32 %v273_v29, %v267_v14 }
  0x57   : > { %v276_v35 = vsel %vm275_vm2, %v267_v14, %v274_v32 }
  0x58   : > { %v279_v36 = vsel %vm277_vm3, %v278_v31, %v276_v35 }
  0x59   : > { %v280_v37 = vmul.f32 %v279_v36, %v267_v14 }
  0x5b   : > { %v281_v39 = vmul.f32 %v280_v37, %v257_v34 }
  0x5d   : > { %v284_v40 = vmul.f32 %v283_v38, %v281_v39 }
  0x5f   : > { %v293_v41 = vrot.slane %v284_v40, 4 }
  0x61   : > { %v294_v42 = vadd.f32 %v293_v41, %v284_v40 }
  0x63   : > { %v295_v43 = vrot.slane %v294_v42, 2 }
  0x65   : > { %v296_v44 = vadd.f32 %v295_v43, %v294_v42 }
  0x67   : > { %v297_v45 = vrot.slane %v296_v44, 1 }
  0x69   : > { %v298_v46 = vadd.f32 %v297_v45, %v296_v44 }
  0x6b   : > { %299 = vadd.xlane.f32.xlu0 %v298_v46 }
  0xde   : > { %v300_v47 = vpop.xlane.xlu0 %299 }
  0xdf   : > { %v301_v48 = vmul.f32 0.0078125, %v300_v47 }
  0xe1   : > { %303 = vst.msk [vmem:[%s233_s28] sm:$0x1] %vm302_vm4, %v301_v48 }
  0xe2 PF: > { %s18_s14 = sadd.s32 1, %s589_s14   ;;  %s707_s9 = smov %s573_s10 }
  0xe3   : > { %p15_p2 = scmp.ge.s32.totalorder %s18_s14, 4   ;;  %s708_s10 = smov %s577_s11 }
  0xe4   : > { %s709_s11 = smov %s658_s25  ;;  %s710_s12 = smov %s585_s13 }
  0xe5   : > { %s711_s13 = smov %s713_s16  ;;  %17 = sbr.rel (!%p15_p2) target bundleno = 6 (0x6), region = 89 }
  0xea   :  { %321 = vsyncpa [#allocation4], 1 }
  0xeb   :  { %323 = vsyncpa [#allocation4 + $0x1], 1 }
  0xec   :  { %324 = vsyncpa [#allocation6], 1 }
  0xed   :  { %326 = vsyncpa [#allocation6 + $0x1], 1 }

</bundles_post_ra>
